<compile_context>
chip_gen: v6e
topology: v6e:2x2x1
jax: 0.10.0
libtpu: 0.0.40
codegen_flags: <defaults>
</compile_context>

<pallas_src>
import functools

import jax
import jax.numpy as jnp
import numpy as np
from jax.experimental import pallas as pl
from jax.experimental.pallas import tpu as pltpu

EPS = 1e-5  # torch.nn.InstanceNorm2d default eps (affine=False, no running stats)


def _masked_instance_norm(h, mask, count):
    """Per-row (== per image,channel) InstanceNorm over `count` valid lanes.

    h: (B*C, HW) f32, mask: (1, HW) f32 indicator of valid frame positions.
    Matches torch.nn.InstanceNorm2d(affine=False): biased variance, eps=1e-5."""
    inv_count = 1.0 / float(count)
    mu = jnp.sum(h * mask, axis=1, keepdims=True) * inv_count          # (BC, 1)
    d = h - mu
    var = jnp.sum(d * d * mask, axis=1, keepdims=True) * inv_count     # (BC, 1)
    return d * jax.lax.rsqrt(var + EPS)


def _residual_block_kernel(B, C, H, W, x_ref, w1_ref, b1_ref, w2_ref, b2_ref,
                           wd_ref, bd_ref, m_ref, o_ref):
    HW = H * W
    x = x_ref[...].astype(jnp.float32)          # (B*C, HW), all sublanes live
    mask14 = m_ref[0:1, :]                      # conv1 valid region (H-2)x(W-2)
    mask12 = m_ref[1:2, :]                      # final valid region (H-4)x(W-4)

    def conv(inp, w_ref, b_ref, k):
        """VALID kxk conv over the lane-flattened frame, evaluated on the MXU.

        Taps are realized as static lane rotations (XLU) of the (B*C, HW) slab,
        stacked into a (k*k*B*C, HW) im2col matrix; the block-diagonal weight
        matrix (built in the wrapper) makes one matmul do all images at once.
        Positions whose window crosses an image edge hold garbage; they are
        masked out of the norm statistics and discarded by the wrapper slice."""
        cols = []
        for ki in range(k):
            for kj in range(k):
                off = ki * W + kj
                if off == 0:
                    cols.append(inp)
                else:
                    # shifted[:, p] == inp[:, (p + off) mod HW]
                    cols.append(pltpu.roll(inp, HW - off, 1))
        patches = jnp.concatenate(cols, axis=0)            # (k*k*B*C, HW)
        return jnp.dot(w_ref[...], patches,
                       preferred_element_type=jnp.float32) + b_ref[...]

    # "convs" branch: Conv3x3 -> InstanceNorm -> ReLU -> Conv3x3 -> InstanceNorm
    h = conv(x, w1_ref, b1_ref, 3)
    h = _masked_instance_norm(h, mask14, (H - 2) * (W - 2))
    h = jnp.maximum(h, 0.0)
    h = conv(h, w2_ref, b2_ref, 3)
    h = _masked_instance_norm(h, mask12, (H - 4) * (W - 4))

    # "downsample" branch: Conv5x5 (no norm, no relu)
    d = conv(x, wd_ref, bd_ref, 5)

    # Single lane-dense (B*C, HW) unmasked store; wrapper slices the valid region.
    o_ref[...] = (h + d).astype(o_ref.dtype)


def _block_weight(w, B):
    """(Cout, Cin, k, k) -> (B*Cout, k*k*B*Cin) block-diagonal-per-tap weight matrix
    matching the im2col row order tap*(B*Cin) + b*Cin + ci used in the kernel."""
    Cout, Cin, k, _ = w.shape
    eye_b = jnp.eye(B, dtype=jnp.float32)
    cols = []
    for ki in range(k):
        for kj in range(k):
            cols.append(jnp.kron(eye_b, w[:, :, ki, kj].astype(jnp.float32)))
    return jnp.concatenate(cols, axis=1)


@jax.jit
def residual_block(x, params):
    B, C, H, W = x.shape
    # Roll-based taps and the valid masks are only meaningful when a valid 5x5
    # output region exists; fail loudly otherwise.
    assert H > 4 and W > 4, "residual_block requires H > 4 and W > 4"
    Ho, Wo = H - 4, W - 4                 # two VALID 3x3 convs == one VALID 5x5 conv
    HW = H * W
    BC = B * C
    w1, b1, w2, b2, wd, bd = params

    # Lane-dense repack: pure reshape (NCHW is already contiguous as (B*C, H*W)).
    xr = x.reshape(BC, HW)

    # Block-diagonal weight matrices and per-row biases.
    w1b = _block_weight(w1, B)            # (BC,  9*BC)
    w2b = _block_weight(w2, B)            # (BC,  9*BC)
    wdb = _block_weight(wd, B)            # (BC, 25*BC)
    b1r = jnp.tile(b1.astype(jnp.float32), B).reshape(BC, 1)
    b2r = jnp.tile(b2.astype(jnp.float32), B).reshape(BC, 1)
    bdr = jnp.tile(bd.astype(jnp.float32), B).reshape(BC, 1)

    # Valid-region masks, built with numpy at trace time (compile-time constants).
    rr = np.arange(H).reshape(H, 1)
    cc = np.arange(W).reshape(1, W)
    valid14 = ((rr < H - 2) & (cc < W - 2)).astype(np.float32).reshape(1, HW)
    valid12 = ((rr < H - 4) & (cc < W - 4)).astype(np.float32).reshape(1, HW)
    masks = jnp.asarray(np.concatenate([valid14, valid12], axis=0))   # (2, HW)

    vmem = pl.BlockSpec(memory_space=pltpu.MemorySpace.VMEM)
    kernel = functools.partial(_residual_block_kernel, B, C, H, W)

    out_flat = pl.pallas_call(
        kernel,
        out_shape=jax.ShapeDtypeStruct((BC, HW), jnp.float32),
        in_specs=[vmem] * 8,
        out_specs=vmem,
    )(xr, w1b, b1r, w2b, b2r, wdb, bdr, masks)

    # Slice the VALID region (no transpose needed with this layout).
    return out_flat.reshape(B, C, H, W)[:, :, :Ho, :Wo]


# ---------------- pure-JAX reference (for correctness check) ----------------
def _conv_ref(x, w, b):
    y = jax.lax.conv_general_dilated(
        x, w, window_strides=(1, 1), padding="VALID",
        dimension_numbers=("NCHW", "OIHW", "NCHW"),
        precision=jax.lax.Precision.HIGHEST)
    return y + b[None, :, None, None]


def _inorm_ref(x):
    m = jnp.mean(x, axis=(2, 3), keepdims=True)
    v = jnp.mean((x - m) ** 2, axis=(2, 3), keepdims=True)
    return (x - m) * jax.lax.rsqrt(v + EPS)


def residual_block_ref(x, params):
    w1, b1, w2, b2, wd, bd = params
    h = jnp.maximum(_inorm_ref(_conv_ref(x, w1, b1)), 0.0)
    h = _inorm_ref(_conv_ref(h, w2, b2))
    d = _conv_ref(x, wd, bd)
    return h + d


if __name__ == "__main__":
    B, C, H, W = 2, 4, 16, 16
    key = jax.random.PRNGKey(0)
    kx, k1, k2, k3, k4, k5, k6 = jax.random.split(key, 7)

    x = jax.random.normal(kx, (B, C, H, W), jnp.float32)
    fan3 = C * 3 * 3
    fan5 = C * 5 * 5
    w1 = jax.random.normal(k1, (C, C, 3, 3), jnp.float32) / np.sqrt(fan3)
    b1 = jax.random.normal(k2, (C,), jnp.float32) * 0.1
    w2 = jax.random.normal(k3, (C, C, 3, 3), jnp.float32) / np.sqrt(fan3)
    b2 = jax.random.normal(k4, (C,), jnp.float32) * 0.1
    wd = jax.random.normal(k5, (C, C, 5, 5), jnp.float32) / np.sqrt(fan5)
    bd = jax.random.normal(k6, (C,), jnp.float32) * 0.1
    params = (w1, b1, w2, b2, wd, bd)

    out = residual_block(x, params)
    out = jax.block_until_ready(out)

    ref = residual_block_ref(x, params)
    np.testing.assert_allclose(np.asarray(out), np.asarray(ref),
                               rtol=2e-3, atol=2e-3)
    print("KERNEL_OK")
</pallas_src>

<mosaic_0001>
module attributes {stable_mosaic.version = 11 : i64} {
  func.func @_residual_block_kernel(%arg0: memref<8x256xf32, #tpu.memory_space<vmem>>, %arg1: memref<8x72xf32, #tpu.memory_space<vmem>>, %arg2: memref<8x1xf32, #tpu.memory_space<vmem>>, %arg3: memref<8x72xf32, #tpu.memory_space<vmem>>, %arg4: memref<8x1xf32, #tpu.memory_space<vmem>>, %arg5: memref<8x200xf32, #tpu.memory_space<vmem>>, %arg6: memref<8x1xf32, #tpu.memory_space<vmem>>, %arg7: memref<2x256xf32, #tpu.memory_space<vmem>>, %arg8: memref<8x256xf32, #tpu.memory_space<vmem>>) attributes {dimension_semantics = [], scalar_prefetch = 0 : i64, scratch_operands = 0 : i64, tpu.core_type = #tpu.core_type<tc>} {
    %c0 = arith.constant 0 : index
    %c0_0 = arith.constant 0 : index
    %0 = vector.load %arg0[%c0, %c0_0] : memref<8x256xf32, #tpu.memory_space<vmem>>, vector<8x256xf32>
    %c0_1 = arith.constant 0 : index
    %c0_2 = arith.constant 0 : index
    %1 = vector.load %arg7[%c0_1, %c0_2] : memref<2x256xf32, #tpu.memory_space<vmem>>, vector<1x256xf32>
    %c1 = arith.constant 1 : index
    %c0_3 = arith.constant 0 : index
    %2 = vector.load %arg7[%c1, %c0_3] : memref<2x256xf32, #tpu.memory_space<vmem>>, vector<1x256xf32>
    %c255_i32 = arith.constant 255 : i32
    %3 = tpu.dynamic_rotate %0 by %c255_i32 dim 1 : vector<8x256xf32>, i32 -> vector<8x256xf32>
    %c254_i32 = arith.constant 254 : i32
    %4 = tpu.dynamic_rotate %0 by %c254_i32 dim 1 : vector<8x256xf32>, i32 -> vector<8x256xf32>
    %c240_i32 = arith.constant 240 : i32
    %5 = tpu.dynamic_rotate %0 by %c240_i32 dim 1 : vector<8x256xf32>, i32 -> vector<8x256xf32>
    %c239_i32 = arith.constant 239 : i32
    %6 = tpu.dynamic_rotate %0 by %c239_i32 dim 1 : vector<8x256xf32>, i32 -> vector<8x256xf32>
    %c238_i32 = arith.constant 238 : i32
    %7 = tpu.dynamic_rotate %0 by %c238_i32 dim 1 : vector<8x256xf32>, i32 -> vector<8x256xf32>
    %c224_i32 = arith.constant 224 : i32
    %8 = tpu.dynamic_rotate %0 by %c224_i32 dim 1 : vector<8x256xf32>, i32 -> vector<8x256xf32>
    %c223_i32 = arith.constant 223 : i32
    %9 = tpu.dynamic_rotate %0 by %c223_i32 dim 1 : vector<8x256xf32>, i32 -> vector<8x256xf32>
    %c222_i32 = arith.constant 222 : i32
    %10 = tpu.dynamic_rotate %0 by %c222_i32 dim 1 : vector<8x256xf32>, i32 -> vector<8x256xf32>
    %11 = tpu.concatenate %0, %3, %4, %5, %6, %7, %8, %9, %10 in 0 : vector<8x256xf32>, vector<8x256xf32>, vector<8x256xf32>, vector<8x256xf32>, vector<8x256xf32>, vector<8x256xf32>, vector<8x256xf32>, vector<8x256xf32>, vector<8x256xf32> -> vector<72x256xf32>
    %c0_4 = arith.constant 0 : index
    %c0_5 = arith.constant 0 : index
    %12 = vector.load %arg1[%c0_4, %c0_5] : memref<8x72xf32, #tpu.memory_space<vmem>>, vector<8x72xf32>
    %cst = arith.constant dense<0.000000e+00> : vector<8x256xf32>
    %13 = tpu.matmul %12, %11, %cst {dimension_numbers = #tpu.dot_dimension_numbers<[1], [0], [0], [1], [0, 0, 1, 1], [], []>} : vector<8x72xf32>, vector<72x256xf32>, vector<8x256xf32> -> vector<8x256xf32>
    %c0_6 = arith.constant 0 : index
    %c0_7 = arith.constant 0 : index
    %14 = vector.load %arg2[%c0_6, %c0_7] : memref<8x1xf32, #tpu.memory_space<vmem>>, vector<8x1xf32>
    %15 = vector.broadcast %14 : vector<8x1xf32> to vector<8x256xf32>
    %16 = arith.addf %13, %15 : vector<8x256xf32>
    %17 = vector.broadcast %1 : vector<1x256xf32> to vector<8x256xf32>
    %18 = arith.mulf %16, %17 : vector<8x256xf32>
    %cst_8 = arith.constant dense<0.000000e+00> : vector<8xf32>
    %19 = vector.multi_reduction <add>, %18, %cst_8 [1] : vector<8x256xf32> to vector<8xf32>
    %20 = vector.shape_cast %19 : vector<8xf32> to vector<8x1xf32>
    %cst_9 = arith.constant 0.00510204071 : f32
    %21 = vector.broadcast %cst_9 : f32 to vector<8x1xf32>
    %22 = arith.mulf %20, %21 : vector<8x1xf32>
    %23 = vector.broadcast %22 : vector<8x1xf32> to vector<8x256xf32>
    %24 = arith.subf %16, %23 : vector<8x256xf32>
    %25 = arith.mulf %24, %24 : vector<8x256xf32>
    %26 = vector.broadcast %1 : vector<1x256xf32> to vector<8x256xf32>
    %27 = arith.mulf %25, %26 : vector<8x256xf32>
    %cst_10 = arith.constant dense<0.000000e+00> : vector<8xf32>
    %28 = vector.multi_reduction <add>, %27, %cst_10 [1] : vector<8x256xf32> to vector<8xf32>
    %29 = vector.shape_cast %28 : vector<8xf32> to vector<8x1xf32>
    %cst_11 = arith.constant 0.00510204071 : f32
    %30 = vector.broadcast %cst_11 : f32 to vector<8x1xf32>
    %31 = arith.mulf %29, %30 : vector<8x1xf32>
    %cst_12 = arith.constant 9.99999974E-6 : f32
    %32 = vector.broadcast %cst_12 : f32 to vector<8x1xf32>
    %33 = arith.addf %31, %32 : vector<8x1xf32>
    %34 = math.rsqrt %33 : vector<8x1xf32>
    %35 = vector.broadcast %34 : vector<8x1xf32> to vector<8x256xf32>
    %36 = arith.mulf %24, %35 : vector<8x256xf32>
    %cst_13 = arith.constant 0.000000e+00 : f32
    %37 = vector.broadcast %cst_13 : f32 to vector<8x256xf32>
    %38 = arith.maximumf %36, %37 : vector<8x256xf32>
    %c255_i32_14 = arith.constant 255 : i32
    %39 = tpu.dynamic_rotate %38 by %c255_i32_14 dim 1 : vector<8x256xf32>, i32 -> vector<8x256xf32>
    %c254_i32_15 = arith.constant 254 : i32
    %40 = tpu.dynamic_rotate %38 by %c254_i32_15 dim 1 : vector<8x256xf32>, i32 -> vector<8x256xf32>
    %c240_i32_16 = arith.constant 240 : i32
    %41 = tpu.dynamic_rotate %38 by %c240_i32_16 dim 1 : vector<8x256xf32>, i32 -> vector<8x256xf32>
    %c239_i32_17 = arith.constant 239 : i32
    %42 = tpu.dynamic_rotate %38 by %c239_i32_17 dim 1 : vector<8x256xf32>, i32 -> vector<8x256xf32>
    %c238_i32_18 = arith.constant 238 : i32
    %43 = tpu.dynamic_rotate %38 by %c238_i32_18 dim 1 : vector<8x256xf32>, i32 -> vector<8x256xf32>
    %c224_i32_19 = arith.constant 224 : i32
    %44 = tpu.dynamic_rotate %38 by %c224_i32_19 dim 1 : vector<8x256xf32>, i32 -> vector<8x256xf32>
    %c223_i32_20 = arith.constant 223 : i32
    %45 = tpu.dynamic_rotate %38 by %c223_i32_20 dim 1 : vector<8x256xf32>, i32 -> vector<8x256xf32>
    %c222_i32_21 = arith.constant 222 : i32
    %46 = tpu.dynamic_rotate %38 by %c222_i32_21 dim 1 : vector<8x256xf32>, i32 -> vector<8x256xf32>
    %47 = tpu.concatenate %38, %39, %40, %41, %42, %43, %44, %45, %46 in 0 : vector<8x256xf32>, vector<8x256xf32>, vector<8x256xf32>, vector<8x256xf32>, vector<8x256xf32>, vector<8x256xf32>, vector<8x256xf32>, vector<8x256xf32>, vector<8x256xf32> -> vector<72x256xf32>
    %c0_22 = arith.constant 0 : index
    %c0_23 = arith.constant 0 : index
    %48 = vector.load %arg3[%c0_22, %c0_23] : memref<8x72xf32, #tpu.memory_space<vmem>>, vector<8x72xf32>
    %cst_24 = arith.constant dense<0.000000e+00> : vector<8x256xf32>
    %49 = tpu.matmul %48, %47, %cst_24 {dimension_numbers = #tpu.dot_dimension_numbers<[1], [0], [0], [1], [0, 0, 1, 1], [], []>} : vector<8x72xf32>, vector<72x256xf32>, vector<8x256xf32> -> vector<8x256xf32>
    %c0_25 = arith.constant 0 : index
    %c0_26 = arith.constant 0 : index
    %50 = vector.load %arg4[%c0_25, %c0_26] : memref<8x1xf32, #tpu.memory_space<vmem>>, vector<8x1xf32>
    %51 = vector.broadcast %50 : vector<8x1xf32> to vector<8x256xf32>
    %52 = arith.addf %49, %51 : vector<8x256xf32>
    %53 = vector.broadcast %2 : vector<1x256xf32> to vector<8x256xf32>
    %54 = arith.mulf %52, %53 : vector<8x256xf32>
    %cst_27 = arith.constant dense<0.000000e+00> : vector<8xf32>
    %55 = vector.multi_reduction <add>, %54, %cst_27 [1] : vector<8x256xf32> to vector<8xf32>
    %56 = vector.shape_cast %55 : vector<8xf32> to vector<8x1xf32>
    %cst_28 = arith.constant 0.0069444445 : f32
    %57 = vector.broadcast %cst_28 : f32 to vector<8x1xf32>
    %58 = arith.mulf %56, %57 : vector<8x1xf32>
    %59 = vector.broadcast %58 : vector<8x1xf32> to vector<8x256xf32>
    %60 = arith.subf %52, %59 : vector<8x256xf32>
    %61 = arith.mulf %60, %60 : vector<8x256xf32>
    %62 = vector.broadcast %2 : vector<1x256xf32> to vector<8x256xf32>
    %63 = arith.mulf %61, %62 : vector<8x256xf32>
    %cst_29 = arith.constant dense<0.000000e+00> : vector<8xf32>
    %64 = vector.multi_reduction <add>, %63, %cst_29 [1] : vector<8x256xf32> to vector<8xf32>
    %65 = vector.shape_cast %64 : vector<8xf32> to vector<8x1xf32>
    %cst_30 = arith.constant 0.0069444445 : f32
    %66 = vector.broadcast %cst_30 : f32 to vector<8x1xf32>
    %67 = arith.mulf %65, %66 : vector<8x1xf32>
    %cst_31 = arith.constant 9.99999974E-6 : f32
    %68 = vector.broadcast %cst_31 : f32 to vector<8x1xf32>
    %69 = arith.addf %67, %68 : vector<8x1xf32>
    %70 = math.rsqrt %69 : vector<8x1xf32>
    %71 = vector.broadcast %70 : vector<8x1xf32> to vector<8x256xf32>
    %72 = arith.mulf %60, %71 : vector<8x256xf32>
    %c255_i32_32 = arith.constant 255 : i32
    %73 = tpu.dynamic_rotate %0 by %c255_i32_32 dim 1 : vector<8x256xf32>, i32 -> vector<8x256xf32>
    %c254_i32_33 = arith.constant 254 : i32
    %74 = tpu.dynamic_rotate %0 by %c254_i32_33 dim 1 : vector<8x256xf32>, i32 -> vector<8x256xf32>
    %c253_i32 = arith.constant 253 : i32
    %75 = tpu.dynamic_rotate %0 by %c253_i32 dim 1 : vector<8x256xf32>, i32 -> vector<8x256xf32>
    %c252_i32 = arith.constant 252 : i32
    %76 = tpu.dynamic_rotate %0 by %c252_i32 dim 1 : vector<8x256xf32>, i32 -> vector<8x256xf32>
    %c240_i32_34 = arith.constant 240 : i32
    %77 = tpu.dynamic_rotate %0 by %c240_i32_34 dim 1 : vector<8x256xf32>, i32 -> vector<8x256xf32>
    %c239_i32_35 = arith.constant 239 : i32
    %78 = tpu.dynamic_rotate %0 by %c239_i32_35 dim 1 : vector<8x256xf32>, i32 -> vector<8x256xf32>
    %c238_i32_36 = arith.constant 238 : i32
    %79 = tpu.dynamic_rotate %0 by %c238_i32_36 dim 1 : vector<8x256xf32>, i32 -> vector<8x256xf32>
    %c237_i32 = arith.constant 237 : i32
    %80 = tpu.dynamic_rotate %0 by %c237_i32 dim 1 : vector<8x256xf32>, i32 -> vector<8x256xf32>
    %c236_i32 = arith.constant 236 : i32
    %81 = tpu.dynamic_rotate %0 by %c236_i32 dim 1 : vector<8x256xf32>, i32 -> vector<8x256xf32>
    %c224_i32_37 = arith.constant 224 : i32
    %82 = tpu.dynamic_rotate %0 by %c224_i32_37 dim 1 : vector<8x256xf32>, i32 -> vector<8x256xf32>
    %c223_i32_38 = arith.constant 223 : i32
    %83 = tpu.dynamic_rotate %0 by %c223_i32_38 dim 1 : vector<8x256xf32>, i32 -> vector<8x256xf32>
    %c222_i32_39 = arith.constant 222 : i32
    %84 = tpu.dynamic_rotate %0 by %c222_i32_39 dim 1 : vector<8x256xf32>, i32 -> vector<8x256xf32>
    %c221_i32 = arith.constant 221 : i32
    %85 = tpu.dynamic_rotate %0 by %c221_i32 dim 1 : vector<8x256xf32>, i32 -> vector<8x256xf32>
    %c220_i32 = arith.constant 220 : i32
    %86 = tpu.dynamic_rotate %0 by %c220_i32 dim 1 : vector<8x256xf32>, i32 -> vector<8x256xf32>
    %c208_i32 = arith.constant 208 : i32
    %87 = tpu.dynamic_rotate %0 by %c208_i32 dim 1 : vector<8x256xf32>, i32 -> vector<8x256xf32>
    %c207_i32 = arith.constant 207 : i32
    %88 = tpu.dynamic_rotate %0 by %c207_i32 dim 1 : vector<8x256xf32>, i32 -> vector<8x256xf32>
    %c206_i32 = arith.constant 206 : i32
    %89 = tpu.dynamic_rotate %0 by %c206_i32 dim 1 : vector<8x256xf32>, i32 -> vector<8x256xf32>
    %c205_i32 = arith.constant 205 : i32
    %90 = tpu.dynamic_rotate %0 by %c205_i32 dim 1 : vector<8x256xf32>, i32 -> vector<8x256xf32>
    %c204_i32 = arith.constant 204 : i32
    %91 = tpu.dynamic_rotate %0 by %c204_i32 dim 1 : vector<8x256xf32>, i32 -> vector<8x256xf32>
    %c192_i32 = arith.constant 192 : i32
    %92 = tpu.dynamic_rotate %0 by %c192_i32 dim 1 : vector<8x256xf32>, i32 -> vector<8x256xf32>
    %c191_i32 = arith.constant 191 : i32
    %93 = tpu.dynamic_rotate %0 by %c191_i32 dim 1 : vector<8x256xf32>, i32 -> vector<8x256xf32>
    %c190_i32 = arith.constant 190 : i32
    %94 = tpu.dynamic_rotate %0 by %c190_i32 dim 1 : vector<8x256xf32>, i32 -> vector<8x256xf32>
    %c189_i32 = arith.constant 189 : i32
    %95 = tpu.dynamic_rotate %0 by %c189_i32 dim 1 : vector<8x256xf32>, i32 -> vector<8x256xf32>
    %c188_i32 = arith.constant 188 : i32
    %96 = tpu.dynamic_rotate %0 by %c188_i32 dim 1 : vector<8x256xf32>, i32 -> vector<8x256xf32>
    %97 = tpu.concatenate %0, %73, %74, %75, %76, %77, %78, %79, %80, %81, %82, %83, %84, %85, %86, %87 in 0 : vector<8x256xf32>, vector<8x256xf32>, vector<8x256xf32>, vector<8x256xf32>, vector<8x256xf32>, vector<8x256xf32>, vector<8x256xf32>, vector<8x256xf32>, vector<8x256xf32>, vector<8x256xf32>, vector<8x256xf32>, vector<8x256xf32>, vector<8x256xf32>, vector<8x256xf32>, vector<8x256xf32>, vector<8x256xf32> -> vector<128x256xf32>
    %98 = tpu.concatenate %88, %89, %90, %91, %92, %93, %94, %95, %96 in 0 : vector<8x256xf32>, vector<8x256xf32>, vector<8x256xf32>, vector<8x256xf32>, vector<8x256xf32>, vector<8x256xf32>, vector<8x256xf32>, vector<8x256xf32>, vector<8x256xf32> -> vector<72x256xf32>
    %99 = tpu.concatenate %97, %98 in 0 : vector<128x256xf32>, vector<72x256xf32> -> vector<200x256xf32>
    %c0_40 = arith.constant 0 : index
    %c0_41 = arith.constant 0 : index
    %100 = vector.load %arg5[%c0_40, %c0_41] : memref<8x200xf32, #tpu.memory_space<vmem>>, vector<8x200xf32>
    %cst_42 = arith.constant dense<0.000000e+00> : vector<8x256xf32>
    %101 = tpu.matmul %100, %99, %cst_42 {dimension_numbers = #tpu.dot_dimension_numbers<[1], [0], [0], [1], [0, 0, 1, 1], [], []>} : vector<8x200xf32>, vector<200x256xf32>, vector<8x256xf32> -> vector<8x256xf32>
    %c0_43 = arith.constant 0 : index
    %c0_44 = arith.constant 0 : index
    %102 = vector.load %arg6[%c0_43, %c0_44] : memref<8x1xf32, #tpu.memory_space<vmem>>, vector<8x1xf32>
    %103 = vector.broadcast %102 : vector<8x1xf32> to vector<8x256xf32>
    %104 = arith.addf %101, %103 : vector<8x256xf32>
    %105 = arith.addf %72, %104 : vector<8x256xf32>
    %c0_45 = arith.constant 0 : index
    %c0_46 = arith.constant 0 : index
    %106 = vector.load %arg8[%c0_45, %c0_46] : memref<8x256xf32, #tpu.memory_space<vmem>>, vector<8x256xf32>
    tpu.vector_store %arg8[%c0_45, %c0_46], %105 {strides = array<i32>} : memref<8x256xf32, #tpu.memory_space<vmem>>, vector<8x256xf32>,
    return
  }
}

</mosaic_0001>

<bundles_post_ra>
// kernel: tile.18
= control target key start
LH: loop header
LB: loop body
LE: loop exit
PB: predicated region body
PF: predicated region fallthrough
CT: control target
= control target key end

     0   :  { %s22_s0 = inlined_call_operand.vmem [shape: f32[4], index: 0, kind: input, shape index: {}]   ;;  %s23_s1 = inlined_call_operand.vmem [shape: f32[2,4], index: 1, kind: output, shape index: {}]  }
   0x1   :  { %v4_v0 = vld [vmem:[%s22_s0] ss:$0 sm:$0xff] }
   0x2   :  { %5 = vst [vmem:[%s23_s1] sm:$0x3] %v4_v0 }

// kernel: tile.0
= control target key start
LH: loop header
LB: loop body
LE: loop exit
PB: predicated region body
PF: predicated region fallthrough
CT: control target
= control target key end

     0   :  { %s35_s8 = smov 125   ;;  %vm8_vm0 = vcmask 7168   ;;  %s36_s11 = smov 126   ;;  %s62_s0 = inlined_call_operand.vmem [shape: f32[2,4], index: 0, kind: input, shape index: {}]   ;;  %s63_s1 = inlined_call_operand.vmem [shape: f32[8,1], index: 1, kind: output, shape index: {}]  }
   0x1   :  { %v5_v0 = vld [vmem:[%s62_s0] sm:$0x3]  ;;  %s34_s0 = smov 127  }
   0x2   :  { %6 = vst [vmem:[#allocation0] sm:$0x3] %v5_v0 }
   0x9   :  { %v10_v1 = vld [vmem:[#allocation0] sm:$0x3]  }
   0xa   :  { %v22_v2 = vld [vmem:[#allocation0] sm:$0x3]   ;;  %11 = vrot.lane.b32.xlu0 %v10_v1, %s34_s0 }
   0xb   :  { %23 = vrot.lane.b32.xlu1 %v22_v2, %s35_s8  ;;  %v7_v3 = vld [vmem:[#allocation0] sm:$0x3]  }
   0xc   :  { %v16_v4 = vld [vmem:[#allocation0] sm:$0x3]   ;;  %9 = vst.msk [vmem:[%s63_s1] ss:$4 sm:$0x3] %vm8_vm0, %v7_v3  }
   0xe   :  { %17 = vrot.lane.b32.xlu0 %v16_v4, %s36_s11 }
  0x7c   :  { %v12_v5 = vpop.permute.xlu0 %11  }
  0x7d   :  { %v24_v6 = vpop.permute.xlu1 %23   ;;  %28 = vst.msk [vmem:[%s63_s1 + $0x1] ss:$4 sm:$0x3] %vm8_vm0, %v12_v5  }
  0x7e   :  { %30 = vst.msk [vmem:[%s63_s1 + $0x3] ss:$4 sm:$0x3] %vm8_vm0, %v24_v6  }
  0x80   :  { %v18_v7 = vpop.permute.xlu0 %17  }
  0x81   :  { %29 = vst.msk [vmem:[%s63_s1 + $0x2] ss:$4 sm:$0x3] %vm8_vm0, %v18_v7  }

// kernel: residual_block.1
= control target key start
LH: loop header
LB: loop body
LE: loop exit
PB: predicated region body
PF: predicated region fallthrough
CT: control target
= control target key end

     0   :  { %s604_s29 = smov 95   ;;  %s605_s30 = smov 94   ;;  %v609_v2 = vmov 0.0   ;;  %v611_v3 = vmov 0   ;;  %v38_v5 = vlaneseq  ;;  %vm99_vm8 = vcmask 588800   ;;  %s997_s0 = inlined_call_operand.vmem [shape: f32[8,256], index: 0, kind: input, shape index: {}]   ;;  %s998_s2 = inlined_call_operand.vmem [shape: f32[8,1], index: 2, kind: input, shape index: {}]   ;;  %s999_s1 = inlined_call_operand.vmem [shape: f32[8,72], index: 1, kind: input, shape index: {}]   ;;  %s1000_s7 = inlined_call_operand.vmem [shape: f32[2,256], index: 7, kind: input, shape index: {}]   ;;  %s1001_s4 = inlined_call_operand.vmem [shape: f32[8,1], index: 4, kind: input, shape index: {}]   ;;  %s1002_s3 = inlined_call_operand.vmem [shape: f32[8,72], index: 3, kind: input, shape index: {}]   ;;  %s1003_s5 = inlined_call_operand.vmem [shape: f32[8,200], index: 5, kind: input, shape index: {}]   ;;  %s1004_s6 = inlined_call_operand.vmem [shape: f32[8,1], index: 6, kind: input, shape index: {}]   ;;  %s1005_s8 = inlined_call_operand.vmem [shape: f32[8,256], index: 8, kind: output, shape index: {}]  }
   0x1   :  { %v678_v0 = vld [vmem:[%s997_s0] sm:$0xff]  ;;  %v687_v1 = vld [vmem:[%s997_s0 + $0x8] sm:$0xff]  ;;  %s606_s11 = smov 96   ;;  %s607_s12 = smov 110   ;;  %167 = vmatprep.mubr.f32.mxu1 %v609_v2  ;;  %599 = vset.pattern.permute.xlu0 %v611_v3 }
   0x2   :  { %78 = vrot.lane.b32.xlu1 %v678_v0, %s604_s29  ;;  %85 = vrot.lane.b32.xlu0 %v678_v0, %s605_s30  ;;  %s608_s0 = smov 111   ;;  %s610_s13 = smov 112   ;;  %v93_v4 = vld [vmem:[%s998_s2] sm:$0xff]  ;;  %v722_v6 = vand.u32 127, %v38_v5  ;;  %v820_v40 = vshrl.u32 %v38_v5, 7 }
   0x3   :  { %s612_s14 = smov 126   ;;  %s613_s15 = smov 127   ;;  %v92_v39 = vld [vmem:[%s999_s1] sm:$0xff] }
   0x4   :  { %vm89_vm0 = vcmp.lt.s32.totalorder %v722_v6, 94  ;;  %vm82_vm1 = vcmp.lt.s32.totalorder %v722_v6, 95  ;;  %vm75_vm2 = vcmp.lt.s32.totalorder %v722_v6, 96  ;;  %vm68_vm3 = vcmp.lt.s32.totalorder %v722_v6, 110  ;;  %s614_s1 = smov 80   ;;  %s615_s21 = smov 92  }
   0x5   :  { %vm61_vm4 = vcmp.lt.s32.totalorder %v722_v6, 111  ;;  %vm54_vm5 = vcmp.lt.s32.totalorder %v722_v6, 112  ;;  %vm47_vm6 = vcmp.lt.s32.totalorder %v722_v6, 126  ;;  %vm40_vm7 = vcmp.lt.s32.totalorder %v722_v6, 127  ;;  %s616_s22 = smov 93   ;;  %s617_s23 = smov 108  }
   0x6   :  { %80 = vrot.lane.b32.xlu1 %v687_v1, %s604_s29  ;;  %87 = vrot.lane.b32.xlu0 %v687_v1, %s605_s30  ;;  %v181_v41 = vsub.s32 1, %v820_v40  ;;  %v177_v42 = vsub.s32 0, %v820_v40  ;;  %v31_v44 = vld [vmem:[%s1000_s7] ss:$2 sm:$0x3]  ;;  %s618_s24 = smov 109  }
   0x7   :  { %s619_s25 = smov 124   ;;  %s620_s26 = smov 125   ;;  %vm413_vm9 = vcmp.lt.s32.totalorder %v722_v6, 80  ;;  %vm406_vm10 = vcmp.lt.s32.totalorder %v722_v6, 92  ;;  %vm399_vm11 = vcmp.lt.s32.totalorder %v722_v6, 93  ;;  %vm392_vm12 = vcmp.lt.s32.totalorder %v722_v6, 108 }
   0x8   :  { %v182_v47 = vrot.slane %v31_v44, %v181_v41  ;;  %v178_v48 = vrot.slane %v31_v44, %v177_v42  ;;  %s621_s27 = smov 60   ;;  %s622_s28 = smov 61   ;;  %vm385_vm13 = vcmp.lt.s32.totalorder %v722_v6, 109  ;;  %vm378_vm14 = vcmp.lt.s32.totalorder %v722_v6, 124  ;;  %v481_v40 = vld [vmem:[%s1004_s6] sm:$0xff] }
   0x9   :  { %s625_s9 = smov 64   ;;  %s626_s10 = smov 76   ;;  %vm371_vm15 = vcmp.lt.s32.totalorder %v722_v6, 125 }
   0xa   :  { %73 = vrot.lane.b32.xlu1 %v687_v1, %s606_s11  ;;  %71 = vrot.lane.b32.xlu0 %v678_v0, %s606_s11 }
   0xe   :  { %66 = vrot.lane.b32.xlu1 %v687_v1, %s607_s12  ;;  %64 = vrot.lane.b32.xlu0 %v678_v0, %s607_s12 }
  0x12   :  { %59 = vrot.lane.b32.xlu1 %v687_v1, %s608_s0  ;;  %57 = vrot.lane.b32.xlu0 %v678_v0, %s608_s0 }
  0x16   :  { %52 = vrot.lane.b32.xlu1 %v687_v1, %s610_s13  ;;  %50 = vrot.lane.b32.xlu0 %v678_v0, %s610_s13 }
  0x1a   :  { %45 = vrot.lane.b32.xlu1 %v687_v1, %s612_s14  ;;  %43 = vrot.lane.b32.xlu0 %v678_v0, %s612_s14 }
  0x1e   :  { %36 = vrot.lane.b32.xlu1 %v687_v1, %s613_s15  ;;  %34 = vrot.lane.b32.xlu0 %v678_v0, %s613_s15 }
  0x22   :  { %96 = vperm.xlu0 %599, %v93_v4  }
  0x74   :  { %v79_v7 = vpop.permute.xlu1 %78  ;;  %v86_v8 = vpop.permute.xlu0 %85 }
  0x78   :  { %v81_v9 = vpop.permute.xlu1 %80  ;;  %v88_v10 = vpop.permute.xlu0 %87 }
  0x79   :  { %v728_v11 = vsel %vm89_vm0, %v88_v10, %v86_v8  ;;  %v732_v12 = vsel %vm89_vm0, %v86_v8, %v88_v10  ;;  %v739_v13 = vsel %vm82_vm1, %v81_v9, %v79_v7  ;;  %v744_v16 = vsel %vm82_vm1, %v79_v7, %v81_v9  ;;  %v256_v10 = vld [vmem:[%s1001_s4] sm:$0xff] }
  0x7a   :  { %117 = vmatprep.subr.mxu1 %v728_v11 }
  0x7b   :  { %118 = vmatpush1.msra.mxu1 %v732_v12 }
  0x7c   :  { %v74_v14 = vpop.permute.xlu1 %73  ;;  %119 = vmatprep.subr.mxu1 %v739_v13  ;;  %v72_v15 = vpop.permute.xlu0 %71 }
  0x7d   :  { %120 = vmatpush1.msra.mxu1 %v744_v16  ;;  %v749_v17 = vsel %vm75_vm2, %v74_v14, %v72_v15  ;;  %v753_v18 = vsel %vm75_vm2, %v72_v15, %v74_v14 }
  0x7e   :  { %121 = vmatprep.subr.mxu1 %v749_v17 }
  0x7f   :  { %122 = vmatpush1.msra.mxu1 %v753_v18 }
  0x80   :  { %v67_v19 = vpop.permute.xlu1 %66  ;;  %v65_v20 = vpop.permute.xlu0 %64 }
  0x81   :  { %v760_v21 = vsel %vm68_vm3, %v67_v19, %v65_v20  ;;  %v764_v22 = vsel %vm68_vm3, %v65_v20, %v67_v19 }
  0x82   :  { %123 = vmatprep.subr.mxu1 %v760_v21 }
  0x83   :  { %124 = vmatpush1.msra.mxu1 %v764_v22 }
  0x84   :  { %v60_v23 = vpop.permute.xlu1 %59  ;;  %v58_v24 = vpop.permute.xlu0 %57 }
  0x85   :  { %v771_v25 = vsel %vm61_vm4, %v60_v23, %v58_v24  ;;  %v775_v26 = vsel %vm61_vm4, %v58_v24, %v60_v23 }
  0x86   :  { %125 = vmatprep.subr.mxu1 %v771_v25 }
  0x87   :  { %126 = vmatpush1.msra.mxu1 %v775_v26 }
  0x88   :  { %v53_v27 = vpop.permute.xlu1 %52  ;;  %v51_v28 = vpop.permute.xlu0 %50 }
  0x89   :  { %v782_v29 = vsel %vm54_vm5, %v53_v27, %v51_v28  ;;  %v786_v30 = vsel %vm54_vm5, %v51_v28, %v53_v27 }
  0x8a   :  { %127 = vmatprep.subr.mxu1 %v782_v29 }
  0x8b   :  { %128 = vmatpush1.msra.mxu1 %v786_v30 }
  0x8c   :  { %v46_v31 = vpop.permute.xlu1 %45  ;;  %v44_v32 = vpop.permute.xlu0 %43 }
  0x8d   :  { %v793_v33 = vsel %vm47_vm6, %v46_v31, %v44_v32  ;;  %v797_v34 = vsel %vm47_vm6, %v44_v32, %v46_v31 }
  0x8e   :  { %129 = vmatprep.subr.mxu1 %v793_v33 }
  0x8f   :  { %130 = vmatpush1.msra.mxu1 %v797_v34 }
  0x90   :  { %v37_v35 = vpop.permute.xlu1 %36  ;;  %v35_v36 = vpop.permute.xlu0 %34 }
  0x91   :  { %v804_v37 = vsel %vm40_vm7, %v37_v35, %v35_v36  ;;  %v808_v38 = vsel %vm40_vm7, %v35_v36, %v37_v35 }
  0x92   :  { %131 = vmatprep.subr.mxu1 %v804_v37 }
  0x93   :  { %132 = vmatpush1.msra.mxu1 %v808_v38 }
  0x94   :  { %133 = vmatprep.subr.mxu1 %v687_v1 }
  0x95   :  { %134 = vmatpush1.msra.mxu1 %v678_v0 }
  0x96   :  { %570 = vmatmul.mubr.msk.f32.vlgmr.msra.gmra.mxu1 %vm99_vm8, %v92_v39 }
  0x97   :  { %329 = vmatprep.mubr.f32.mxu1 %v609_v2 }
  0x9d   :  { %v97_v43 = vpop.permute.xlu0 %96 }
 0x156   :  { %v169_v45 = vpop.f32.mrf.mxu1 }
 0x157   :  { %v170_v46 = vadd.f32 %v169_v45, %v97_v43 }
 0x158   :  { %v171_v49 = vpop.f32.mrf.mxu1 }
 0x159   :  { %v172_v50 = vadd.f32 %v171_v49, %v97_v43  ;;  %v185_v52 = vmul.f32 %v178_v48, %v170_v46 }
 0x15b   :  { %v186_v51 = vmul.f32 %v182_v47, %v172_v50 }
 0x15d   :  { %v187_v53 = vadd.f32 %v186_v51, %v185_v52 }
 0x15f   :  { %188 = vadd.xlane.f32.xlu1 %v187_v53 }
 0x1e8   :  { %v189_v54 = vpop.xlane.xlu1 %188 }
 0x1e9   :  { %v190_v55 = vmul.f32 0.0051020407, %v189_v54 }
 0x1eb   :  { %v191_v56 = vsub.f32 %v170_v46, %v190_v55  ;;  %v192_v57 = vsub.f32 %v172_v50, %v190_v55 }
 0x1ed   :  { %v193_v58 = vmul.f32 %v191_v56, %v191_v56  ;;  %v194_v59 = vmul.f32 %v192_v57, %v192_v57 }
 0x1ef   :  { %v195_v60 = vmul.f32 %v193_v58, %v178_v48  ;;  %v196_v61 = vmul.f32 %v194_v59, %v182_v47 }
 0x1f1   :  { %v197_v62 = vadd.f32 %v196_v61, %v195_v60 }
 0x1f3   :  { %198 = vadd.xlane.f32.xlu0 %v197_v62 }
 0x27c   :  { %v199_v63 = vpop.xlane.xlu0 %198 }
 0x27d   :  { %v200_v2 = vmul.f32 0.0051020407, %v199_v63 }
 0x27f   :  { %v201_v3 = vadd.f32 1e-05, %v200_v2  ;;  %v255_v2 = vld [vmem:[%s1002_s3] sm:$0xff] }
 0x281   :  { %600 = vrsqrt.f32 %v201_v3 }
 0x28e   :  { %v601_v4 = vpop.eup %600 }
 0x28f   :  { %v203_v5 = vmul.f32 %v601_v4, %v191_v56  ;;  %v204_v7 = vmul.f32 %v601_v4, %v192_v57 }
 0x291   :  { %v831_v8 = vmax.f32 %v203_v5, 0.0  ;;  %v833_v9 = vmax.f32 %v204_v7, 0.0 }
 0x293   :  { %251 = vrot.lane.b32.xlu0 %v833_v9, %s605_s30  ;;  %249 = vrot.lane.b32.xlu1 %v831_v8, %s605_s30  ;;  %s624_s30 = smov 63  }
 0x297   :  { %237 = vrot.lane.b32.xlu0 %v831_v8, %s606_s11  ;;  %243 = vrot.lane.b32.xlu1 %v831_v8, %s604_s29 }
 0x29b   :  { %231 = vrot.lane.b32.xlu0 %v831_v8, %s607_s12  ;;  %245 = vrot.lane.b32.xlu1 %v833_v9, %s604_s29  ;;  %s623_s29 = smov 62  }
 0x29f   :  { %225 = vrot.lane.b32.xlu0 %v831_v8, %s608_s0  ;;  %239 = vrot.lane.b32.xlu1 %v833_v9, %s606_s11  ;;  %s627_s11 = smov 77  }
 0x2a3   :  { %219 = vrot.lane.b32.xlu0 %v831_v8, %s610_s13  ;;  %233 = vrot.lane.b32.xlu1 %v833_v9, %s607_s12  ;;  %s628_s12 = smov 78  }
 0x2a7   :  { %213 = vrot.lane.b32.xlu0 %v831_v8, %s612_s14  ;;  %227 = vrot.lane.b32.xlu1 %v833_v9, %s608_s0  ;;  %s629_s0 = smov 79  }
 0x2ab   :  { %207 = vrot.lane.b32.xlu0 %v831_v8, %s613_s15  ;;  %221 = vrot.lane.b32.xlu1 %v833_v9, %s610_s13 }
 0x2af   :  { %409 = vrot.lane.b32.xlu0 %v678_v0, %s614_s1  ;;  %215 = vrot.lane.b32.xlu1 %v833_v9, %s612_s14 }
 0x2b3   :  { %402 = vrot.lane.b32.xlu0 %v678_v0, %s615_s21  ;;  %209 = vrot.lane.b32.xlu1 %v833_v9, %s613_s15 }
 0x2b7   :  { %395 = vrot.lane.b32.xlu0 %v678_v0, %s616_s22  ;;  %411 = vrot.lane.b32.xlu1 %v687_v1, %s614_s1 }
 0x2bb   :  { %388 = vrot.lane.b32.xlu0 %v678_v0, %s617_s23  ;;  %404 = vrot.lane.b32.xlu1 %v687_v1, %s615_s21 }
 0x2bf   :  { %381 = vrot.lane.b32.xlu0 %v678_v0, %s618_s24  ;;  %397 = vrot.lane.b32.xlu1 %v687_v1, %s616_s22 }
 0x2c3   :  { %374 = vrot.lane.b32.xlu0 %v678_v0, %s619_s25  ;;  %390 = vrot.lane.b32.xlu1 %v687_v1, %s617_s23 }
 0x2c7   :  { %367 = vrot.lane.b32.xlu0 %v678_v0, %s620_s26  ;;  %383 = vrot.lane.b32.xlu1 %v687_v1, %s618_s24 }
 0x2cb   :  { %472 = vrot.lane.b32.xlu0 %v678_v0, %s621_s27  ;;  %376 = vrot.lane.b32.xlu1 %v687_v1, %s619_s25 }
 0x2cf   :  { %465 = vrot.lane.b32.xlu0 %v678_v0, %s622_s28  ;;  %369 = vrot.lane.b32.xlu1 %v687_v1, %s620_s26 }
 0x2d3   :  { %458 = vrot.lane.b32.xlu0 %v678_v0, %s623_s29  ;;  %474 = vrot.lane.b32.xlu1 %v687_v1, %s621_s27 }
 0x2d7   :  { %451 = vrot.lane.b32.xlu0 %v678_v0, %s624_s30  ;;  %467 = vrot.lane.b32.xlu1 %v687_v1, %s622_s28 }
 0x2db   :  { %444 = vrot.lane.b32.xlu0 %v678_v0, %s625_s9  ;;  %460 = vrot.lane.b32.xlu1 %v687_v1, %s623_s29 }
 0x2df   :  { %437 = vrot.lane.b32.xlu0 %v678_v0, %s626_s10  ;;  %453 = vrot.lane.b32.xlu1 %v687_v1, %s624_s30 }
 0x2e3   :  { %430 = vrot.lane.b32.xlu0 %v678_v0, %s627_s11  ;;  %446 = vrot.lane.b32.xlu1 %v687_v1, %s625_s9 }
 0x2e7   :  { %423 = vrot.lane.b32.xlu0 %v678_v0, %s628_s12  ;;  %439 = vrot.lane.b32.xlu1 %v687_v1, %s626_s10 }
 0x2eb   :  { %416 = vrot.lane.b32.xlu0 %v678_v0, %s629_s0  ;;  %432 = vrot.lane.b32.xlu1 %v687_v1, %s627_s11 }
 0x2ef   :  { %259 = vperm.xlu0 %599, %v256_v10   ;;  %425 = vrot.lane.b32.xlu1 %v687_v1, %s628_s12 }
 0x2f3   :  { %418 = vrot.lane.b32.xlu1 %v687_v1, %s629_s0 }
 0x305   :  { %v252_v14 = vpop.permute.xlu0 %251  ;;  %v250_v15 = vpop.permute.xlu1 %249 }
 0x306   :  { %v253_v19 = vsel %vm89_vm0, %v250_v15, %v252_v14  ;;  %v254_v20 = vsel %vm89_vm0, %v252_v14, %v250_v15  ;;  %vm476_vm0 = vcmp.lt.s32.totalorder %v722_v6, 60 }
 0x307   :  { %279 = vmatprep.subr.mxu1 %v254_v20 }
 0x308   :  { %280 = vmatpush1.msra.mxu1 %v253_v19 }
 0x309   :  { %v238_v23 = vpop.permute.xlu0 %237  ;;  %v244_v24 = vpop.permute.xlu1 %243 }
 0x30d   :  { %v232_v27 = vpop.permute.xlu0 %231  ;;  %v246_v28 = vpop.permute.xlu1 %245 }
 0x30e   :  { %v247_v31 = vsel %vm82_vm1, %v244_v24, %v246_v28  ;;  %v248_v32 = vsel %vm82_vm1, %v246_v28, %v244_v24  ;;  %vm469_vm1 = vcmp.lt.s32.totalorder %v722_v6, 61 }
 0x30f   :  { %281 = vmatprep.subr.mxu1 %v248_v32 }
 0x310   :  { %282 = vmatpush1.msra.mxu1 %v247_v31 }
 0x311   :  { %v226_v35 = vpop.permute.xlu0 %225  ;;  %v240_v36 = vpop.permute.xlu1 %239 }
 0x312   :  { %v241_v39 = vsel %vm75_vm2, %v238_v23, %v240_v36  ;;  %v242_v43 = vsel %vm75_vm2, %v240_v36, %v238_v23  ;;  %vm462_vm2 = vcmp.lt.s32.totalorder %v722_v6, 62 }
 0x313   :  { %283 = vmatprep.subr.mxu1 %v242_v43 }
 0x314   :  { %284 = vmatpush1.msra.mxu1 %v241_v39 }
 0x315   :  { %v220_v44 = vpop.permute.xlu0 %219  ;;  %v234_v45 = vpop.permute.xlu1 %233 }
 0x316   :  { %v235_v46 = vsel %vm68_vm3, %v232_v27, %v234_v45  ;;  %v236_v47 = vsel %vm68_vm3, %v234_v45, %v232_v27  ;;  %vm455_vm3 = vcmp.lt.s32.totalorder %v722_v6, 63 }
 0x317   :  { %285 = vmatprep.subr.mxu1 %v236_v47 }
 0x318   :  { %286 = vmatpush1.msra.mxu1 %v235_v46 }
 0x319   :  { %v214_v48 = vpop.permute.xlu0 %213  ;;  %v228_v49 = vpop.permute.xlu1 %227 }
 0x31a   :  { %v229_v50 = vsel %vm61_vm4, %v226_v35, %v228_v49  ;;  %v230_v51 = vsel %vm61_vm4, %v228_v49, %v226_v35  ;;  %vm448_vm4 = vcmp.lt.s32.totalorder %v722_v6, 64 }
 0x31b   :  { %287 = vmatprep.subr.mxu1 %v230_v51 }
 0x31c   :  { %288 = vmatpush1.msra.mxu1 %v229_v50 }
 0x31d   :  { %v208_v52 = vpop.permute.xlu0 %207  ;;  %v222_v53 = vpop.permute.xlu1 %221 }
 0x31e   :  { %v223_v54 = vsel %vm54_vm5, %v220_v44, %v222_v53  ;;  %v224_v55 = vsel %vm54_vm5, %v222_v53, %v220_v44  ;;  %vm441_vm5 = vcmp.lt.s32.totalorder %v722_v6, 76 }
 0x31f   :  { %289 = vmatprep.subr.mxu1 %v224_v55 }
 0x320   :  { %290 = vmatpush1.msra.mxu1 %v223_v54 }
 0x321   :  { %v216_v56 = vpop.permute.xlu1 %215  ;;  %v410_v57 = vpop.permute.xlu0 %409 }
 0x322   :  { %v217_v58 = vsel %vm47_vm6, %v214_v48, %v216_v56  ;;  %v218_v59 = vsel %vm47_vm6, %v216_v56, %v214_v48  ;;  %vm434_vm6 = vcmp.lt.s32.totalorder %v722_v6, 77 }
 0x323   :  { %291 = vmatprep.subr.mxu1 %v218_v59 }
 0x324   :  { %292 = vmatpush1.msra.mxu1 %v217_v58 }
 0x325   :  { %v210_v60 = vpop.permute.xlu1 %209  ;;  %v403_v61 = vpop.permute.xlu0 %402 }
 0x326   :  { %v211_v62 = vsel %vm40_vm7, %v208_v52, %v210_v60  ;;  %v212_v63 = vsel %vm40_vm7, %v210_v60, %v208_v52  ;;  %vm427_vm7 = vcmp.lt.s32.totalorder %v722_v6, 78 }
 0x327   :  { %293 = vmatprep.subr.mxu1 %v212_v63 }
 0x328   :  { %294 = vmatpush1.msra.mxu1 %v211_v62 }
 0x329   :  { %295 = vmatprep.subr.mxu1 %v833_v9  ;;  %v412_v3 = vpop.permute.xlu1 %411  ;;  %v396_v4 = vpop.permute.xlu0 %395 }
 0x32a   :  { %296 = vmatpush1.msra.mxu1 %v831_v8  ;;  %v415_v5 = vsel %vm413_vm9, %v412_v3, %v410_v57  ;;  %v414_v7 = vsel %vm413_vm9, %v410_v57, %v412_v3  ;;  %vm420_vm9 = vcmp.lt.s32.totalorder %v722_v6, 79  ;;  %v569_v6 = vld [vmem:[%s1000_s7 + $0x1] ss:$2 sm:$0x3] }
 0x32b   :  { %571 = vmatmul.mubr.msk.f32.vlgmr.msra.gmra.mxu1 %vm99_vm8, %v255_v2  ;;  %490 = vmatprep.subr.mxu0 %v415_v5  ;;  %v480_v5 = vld [vmem:[%s1003_s5 + $0x8] sm:$0xff] }
 0x32c   :  { %491 = vmatpush1.msra.mxu0 %v414_v7  ;;  %v479_v7 = vld [vmem:[%s1003_s5] sm:$0xff]  ;;  %572 = vmatprep.mubr.msk.f32.mxu0 %vm99_vm8, %v480_v5 }
 0x32d   :  { %v405_v10 = vpop.permute.xlu1 %404  ;;  %v389_v14 = vpop.permute.xlu0 %388 }
 0x32e   :  { %v408_v15 = vsel %vm406_vm10, %v405_v10, %v403_v61  ;;  %v407_v19 = vsel %vm406_vm10, %v403_v61, %v405_v10 }
 0x32f   :  { %492 = vmatprep.subr.mxu0 %v408_v15 }
 0x330   :  { %493 = vmatpush1.msra.mxu0 %v407_v19  ;;  %v340_v19 = vrot.slane %v569_v6, %v177_v42 }
 0x331   :  { %v398_v9 = vpop.permute.xlu1 %397  ;;  %v382_v20 = vpop.permute.xlu0 %381 }
 0x332   :  { %v401_v23 = vsel %vm399_vm11, %v398_v9, %v396_v4  ;;  %v400_v8 = vsel %vm399_vm11, %v396_v4, %v398_v9  ;;  %v344_v9 = vrot.slane %v569_v6, %v181_v41 }
 0x333   :  { %494 = vmatprep.subr.mxu0 %v401_v23 }
 0x334   :  { %495 = vmatpush1.msra.mxu0 %v400_v8 }
 0x335   :  { %496 = vmatprep.subr.mxu0 %v728_v11  ;;  %v391_v24 = vpop.permute.xlu1 %390  ;;  %v375_v27 = vpop.permute.xlu0 %374 }
 0x336   :  { %497 = vmatpush1.msra.mxu0 %v732_v12  ;;  %v394_v28 = vsel %vm392_vm12, %v391_v24, %v389_v14  ;;  %v393_v32 = vsel %vm392_vm12, %v389_v14, %v391_v24 }
 0x337   :  { %498 = vmatprep.subr.mxu0 %v739_v13 }
 0x338   :  { %499 = vmatpush1.msra.mxu0 %v744_v16 }
 0x339   :  { %500 = vmatprep.subr.mxu0 %v749_v17  ;;  %v384_v31 = vpop.permute.xlu1 %383  ;;  %v368_v35 = vpop.permute.xlu0 %367 }
 0x33a   :  { %501 = vmatpush1.msra.mxu0 %v753_v18  ;;  %v387_v11 = vsel %vm385_vm13, %v384_v31, %v382_v20  ;;  %v386_v36 = vsel %vm385_vm13, %v382_v20, %v384_v31 }
 0x33b   :  { %502 = vmatprep.subr.mxu0 %v394_v28 }
 0x33c   :  { %503 = vmatpush1.msra.mxu0 %v393_v32 }
 0x33d   :  { %504 = vmatprep.subr.mxu0 %v387_v11  ;;  %v377_v12 = vpop.permute.xlu1 %376  ;;  %v473_v39 = vpop.permute.xlu0 %472 }
 0x33e   :  { %505 = vmatpush1.msra.mxu0 %v386_v36  ;;  %v380_v17 = vsel %vm378_vm14, %v377_v12, %v375_v27  ;;  %v379_v18 = vsel %vm378_vm14, %v375_v27, %v377_v12 }
 0x33f   :  { %506 = vmatprep.subr.mxu0 %v760_v21 }
 0x340   :  { %507 = vmatpush1.msra.mxu0 %v764_v22 }
 0x341   :  { %508 = vmatprep.subr.mxu0 %v771_v25  ;;  %v370_v13 = vpop.permute.xlu1 %369  ;;  %v466_v16 = vpop.permute.xlu0 %465 }
 0x342   :  { %509 = vmatpush1.msra.mxu0 %v775_v26  ;;  %v373_v43 = vsel %vm371_vm15, %v370_v13, %v368_v35  ;;  %v372_v21 = vsel %vm371_vm15, %v368_v35, %v370_v13 }
 0x343   :  { %510 = vmatprep.subr.mxu0 %v782_v29 }
 0x344   :  { %511 = vmatpush1.msra.mxu0 %v786_v30 }
 0x345   :  { %512 = vmatprep.subr.mxu0 %v380_v17  ;;  %v459_v44 = vpop.permute.xlu0 %458  ;;  %v475_v45 = vpop.permute.xlu1 %474 }
 0x346   :  { %513 = vmatpush1.msra.mxu0 %v379_v18  ;;  %v478_v26 = vsel %vm476_vm0, %v475_v45, %v473_v39  ;;  %v477_v30 = vsel %vm476_vm0, %v473_v39, %v475_v45 }
 0x347   :  { %514 = vmatprep.subr.mxu0 %v373_v43 }
 0x348   :  { %515 = vmatpush1.msra.mxu0 %v372_v21 }
 0x349   :  { %516 = vmatprep.subr.mxu0 %v793_v33  ;;  %v452_v22 = vpop.permute.xlu0 %451  ;;  %v468_v25 = vpop.permute.xlu1 %467 }
 0x34a   :  { %517 = vmatpush1.msra.mxu0 %v797_v34  ;;  %v471_v33 = vsel %vm469_vm1, %v468_v25, %v466_v16  ;;  %v470_v47 = vsel %vm469_vm1, %v466_v16, %v468_v25 }
 0x34b   :  { %518 = vmatprep.subr.mxu0 %v804_v37 }
 0x34c   :  { %519 = vmatpush1.msra.mxu0 %v808_v38 }
 0x34d   :  { %v445_v29 = vpop.permute.xlu0 %444  ;;  %520 = vmatprep.subr.mxu0 %v687_v1  ;;  %v461_v46 = vpop.permute.xlu1 %460 }
 0x34e   :  { %521 = vmatpush1.msra.mxu0 %v678_v0  ;;  %v464_v34 = vsel %vm462_vm2, %v461_v46, %v459_v44  ;;  %v463_v37 = vsel %vm462_vm2, %v459_v44, %v461_v46 }
 0x34f   :  { %536 = vmatprep.subr.mxu0 %v478_v26 }
 0x350   :  { %537 = vmatpush2.msra.mxu0 %v477_v30 }
 0x351   :  { %538 = vmatprep.subr.mxu0 %v471_v33  ;;  %v454_v38 = vpop.permute.xlu1 %453  ;;  %v438_v49 = vpop.permute.xlu0 %437 }
 0x352   :  { %539 = vmatpush2.msra.mxu0 %v470_v47  ;;  %v457_v48 = vsel %vm455_vm3, %v454_v38, %v452_v22  ;;  %v456_v1 = vsel %vm455_vm3, %v452_v22, %v454_v38 }
 0x353   :  { %540 = vmatprep.subr.mxu0 %v464_v34 }
 0x354   :  { %541 = vmatpush2.msra.mxu0 %v463_v37 }
 0x355   :  { %542 = vmatprep.subr.mxu0 %v457_v48  ;;  %v447_v0 = vpop.permute.xlu1 %446  ;;  %v431_v52 = vpop.permute.xlu0 %430 }
 0x356   :  { %543 = vmatpush2.msra.mxu0 %v456_v1  ;;  %v450_v50 = vsel %vm448_vm4, %v447_v0, %v445_v29  ;;  %v449_v51 = vsel %vm448_vm4, %v445_v29, %v447_v0 }
 0x357   :  { %544 = vmatprep.subr.mxu0 %v450_v50 }
 0x358   :  { %545 = vmatpush2.msra.mxu0 %v449_v51 }
 0x359   :  { %v440_v53 = vpop.permute.xlu1 %439  ;;  %v424_v59 = vpop.permute.xlu0 %423 }
 0x35a   :  { %v443_v54 = vsel %vm441_vm5, %v440_v53, %v438_v49  ;;  %v442_v55 = vsel %vm441_vm5, %v438_v49, %v440_v53 }
 0x35b   :  { %546 = vmatprep.subr.mxu0 %v443_v54 }
 0x35c   :  { %547 = vmatpush2.msra.mxu0 %v442_v55 }
 0x35d   :  { %v433_v56 = vpop.permute.xlu1 %432  ;;  %v417_v63 = vpop.permute.xlu0 %416 }
 0x35e   :  { %v436_v57 = vsel %vm434_vm6, %v433_v56, %v431_v52  ;;  %v435_v58 = vsel %vm434_vm6, %v431_v52, %v433_v56 }
 0x35f   :  { %548 = vmatprep.subr.mxu0 %v436_v57 }
 0x360   :  { %549 = vmatpush2.msra.mxu0 %v435_v58 }
 0x361   :  { %v426_v60 = vpop.permute.xlu1 %425 }
 0x362   :  { %v429_v61 = vsel %vm427_vm7, %v426_v60, %v424_v59  ;;  %v428_v62 = vsel %vm427_vm7, %v424_v59, %v426_v60 }
 0x363   :  { %550 = vmatprep.subr.mxu0 %v429_v61 }
 0x364   :  { %551 = vmatpush2.msra.mxu0 %v428_v62 }
 0x365   :  { %v419_v2 = vpop.permute.xlu1 %418 }
 0x366   :  { %v422_v3 = vsel %vm420_vm9, %v419_v2, %v417_v63  ;;  %v421_v4 = vsel %vm420_vm9, %v417_v63, %v419_v2 }
 0x367   :  { %552 = vmatprep.subr.mxu0 %v422_v3 }
 0x368   :  { %553 = vmatpush2.msra.mxu0 %v421_v4 }
 0x369   :  { %555 = vmatmul.mubr.f32.vlgmr.msra.gmra.mxu0 %v479_v7 }
 0x36a   :  { %v260_v10 = vpop.permute.xlu0 %259 }
 0x3eb   :  { %v331_v14 = vpop.f32.mrf.mxu1 }
 0x3ec   :  { %v332_v15 = vadd.f32 %v331_v14, %v260_v10 }
 0x3ed   :  { %v333_v20 = vpop.f32.mrf.mxu1 }
 0x3ee   :  { %v334_v23 = vadd.f32 %v333_v20, %v260_v10  ;;  %v347_v8 = vmul.f32 %v340_v19, %v332_v15 }
 0x3f0   :  { %v348_v24 = vmul.f32 %v344_v9, %v334_v23 }
 0x3f2   :  { %v349_v27 = vadd.f32 %v348_v24, %v347_v8 }
 0x3f4   :  { %350 = vadd.xlane.f32.xlu1 %v349_v27 }
 0x429   :  { %v556_v17 = vpop.f32.mrf.mxu0 }
 0x42b   :  { %v558_v18 = vpop.f32.mrf.mxu0 }
 0x47d   :  { %v351_v28 = vpop.xlane.xlu1 %350 }
 0x47e   :  { %v352_v31 = vmul.f32 0.0069444445, %v351_v28 }
 0x480   :  { %v353_v32 = vsub.f32 %v332_v15, %v352_v31  ;;  %v354_v35 = vsub.f32 %v334_v23, %v352_v31 }
 0x482   :  { %v355_v11 = vmul.f32 %v353_v32, %v353_v32  ;;  %v356_v36 = vmul.f32 %v354_v35, %v354_v35 }
 0x484   :  { %v357_v12 = vmul.f32 %v355_v11, %v340_v19  ;;  %v358_v39 = vmul.f32 %v356_v36, %v344_v9 }
 0x486   :  { %v359_v13 = vadd.f32 %v358_v39, %v357_v12 }
 0x488   :  { %360 = vadd.xlane.f32.xlu0 %v359_v13 }
 0x49e   :  { %484 = vperm.xlu0 %599, %v481_v40  }
 0x511   :  { %v361_v41 = vpop.xlane.xlu0 %360 }
 0x512   :  { %v362_v42 = vmul.f32 0.0069444445, %v361_v41 }
 0x514   :  { %v363_v16 = vadd.f32 1e-05, %v362_v42 }
 0x516   :  { %602 = vrsqrt.f32 %v363_v16 }
 0x519   :  { %v485_v43 = vpop.permute.xlu0 %484 }
 0x51a   :  { %v557_v22 = vadd.f32 %v556_v17, %v485_v43  ;;  %v559_v25 = vadd.f32 %v558_v18, %v485_v43 }
 0x523   :  { %v603_v21 = vpop.eup %602 }
 0x524   :  { %v365_v44 = vmul.f32 %v603_v21, %v353_v32  ;;  %v366_v45 = vmul.f32 %v603_v21, %v354_v35 }
 0x526   :  { %v561_v26 = vadd.f32 %v557_v22, %v365_v44  ;;  %v562_v29 = vadd.f32 %v559_v25, %v366_v45 }
 0x528   :  { %563 = vst [vmem:[%s1005_s8] sm:$0xff] %v561_v26  ;;  %564 = vst [vmem:[%s1005_s8 + $0x8] sm:$0xff] %v562_v29 }

</bundles_post_ra>
